<compile_context>
chip_gen: v6e
topology: v6e:2x2x1
jax: 0.10.0
libtpu: 0.0.40
codegen_flags: <defaults>
</compile_context>

<pallas_src>
import functools

import jax
import jax.numpy as jnp
from jax.experimental import pallas as pl
from jax.experimental.pallas import tpu as pltpu

_LANE = 128
_SUBLANE = 8


def _round_up(x, m):
    return (x + m - 1) // m * m


def _linear(a, w_ref, b_ref):
    """a @ W + b with f32 accumulation; MXU operands cast to W's dtype."""
    w = w_ref[...]
    y = jnp.dot(a.astype(w.dtype), w, preferred_element_type=jnp.float32)
    return y + b_ref[...].astype(jnp.float32)


def _forward_body(x_ref, w1_ref, b1_ref, wr_ref, br_ref, wl_ref, bl_ref):
    x = x_ref[...].astype(jnp.float32)                        # (TB, K)
    # first: Linear + ReLU
    h = jnp.maximum(_linear(x, w1_ref, b1_ref), 0.0)          # (TB, D)
    # residual block (n_residual_layers = 1): relu(Linear(h)) + h
    h = jnp.maximum(_linear(h, wr_ref, br_ref), 0.0) + h      # (TB, D)
    # last: Linear (lane-padded classes, no activation)
    logits = _linear(h, wl_ref, bl_ref)                       # (TB, C_pad)
    return logits, h


def _kernel_logits(x_ref, w1_ref, b1_ref, wr_ref, br_ref, wl_ref, bl_ref,
                   out_ref):
    logits, _ = _forward_body(x_ref, w1_ref, b1_ref, wr_ref, br_ref,
                              wl_ref, bl_ref)
    out_ref[...] = logits.astype(out_ref.dtype)


def _kernel_logits_feats(x_ref, w1_ref, b1_ref, wr_ref, br_ref, wl_ref, bl_ref,
                         out_ref, feat_ref):
    logits, h = _forward_body(x_ref, w1_ref, b1_ref, wr_ref, br_ref,
                              wl_ref, bl_ref)
    feat_ref[...] = h.astype(feat_ref.dtype)
    out_ref[...] = logits.astype(out_ref.dtype)


@functools.partial(
    jax.jit, static_argnames=("num_classes", "return_features", "block_batch"))
def tabular_resnet_forward(x, params, num_classes, return_features=False,
                           block_batch=256):
    """Fused TabularResNet forward.  params holds padded, pre-transposed weights."""
    w1, b1 = params["w1"], params["b1"]
    wr, br = params["wr"], params["br"]
    wl, bl = params["wl"], params["bl"]

    batch, k_in = x.shape
    k_pad = w1.shape[0]
    feature_dim = w1.shape[1]
    c_pad = wl.shape[1]

    # Sublane-align the contraction dim of the first matmul if needed.
    if k_in != k_pad:
        x = jnp.pad(x, ((0, 0), (0, k_pad - k_in)))

    # Batch tiling: biggest tile <= block_batch, batch zero-padded to a multiple.
    tb = min(block_batch, _round_up(batch, _SUBLANE))
    padded_batch = _round_up(batch, tb)
    if padded_batch != batch:
        x = jnp.pad(x, ((0, padded_batch - batch), (0, 0)))
    grid = (padded_batch // tb,)

    # Row tiles advance with the grid; weights/biases stay VMEM-resident.
    x_spec = pl.BlockSpec((tb, k_pad), lambda i: (i, 0))
    const = lambda shape: pl.BlockSpec(shape, lambda i: (0, 0))
    out_spec = pl.BlockSpec((tb, c_pad), lambda i: (i, 0))
    feat_spec = pl.BlockSpec((tb, feature_dim), lambda i: (i, 0))

    in_specs = [x_spec,
                const(w1.shape), const(b1.shape),
                const(wr.shape), const(br.shape),
                const(wl.shape), const(bl.shape)]

    flops = 2 * padded_batch * (k_pad * feature_dim
                                + feature_dim * feature_dim
                                + feature_dim * c_pad)
    w_bytes = sum(int(a.size) * a.dtype.itemsize for a in (w1, b1, wr, br, wl, bl))
    io_bytes = (padded_batch * k_pad
                + padded_batch * c_pad
                + (padded_batch * feature_dim if return_features else 0)) * 4
    cost = pl.CostEstimate(flops=int(flops), transcendentals=0,
                           bytes_accessed=int(w_bytes + io_bytes))

    compiler_params = pltpu.CompilerParams(
        dimension_semantics=("parallel",))  # megacore shard on v7x

    if return_features:
        out, feats = pl.pallas_call(
            _kernel_logits_feats,
            out_shape=(
                jax.ShapeDtypeStruct((padded_batch, c_pad), jnp.float32),
                jax.ShapeDtypeStruct((padded_batch, feature_dim), jnp.float32),
            ),
            grid_spec=pltpu.PrefetchScalarGridSpec(
                num_scalar_prefetch=0,
                grid=grid,
                in_specs=in_specs,
                out_specs=[out_spec, feat_spec],
            ),
            compiler_params=compiler_params,
            cost_estimate=cost,
        )(x, w1, b1, wr, br, wl, bl)
        return out[:batch, :num_classes], feats[:batch, :]

    out = pl.pallas_call(
        _kernel_logits,
        out_shape=jax.ShapeDtypeStruct((padded_batch, c_pad), jnp.float32),
        grid_spec=pltpu.PrefetchScalarGridSpec(
            num_scalar_prefetch=0,
            grid=grid,
            in_specs=in_specs,
            out_specs=out_spec,
        ),
        compiler_params=compiler_params,
        cost_estimate=cost,
    )(x, w1, b1, wr, br, wl, bl)
    return out[:batch, :num_classes]


def init_params(key, in_features, feature_dim, num_classes,
                weight_dtype=jnp.float32):
    """PyTorch nn.Linear-style uniform init; weights stored (in_dim, out_dim).

    Padding done once, offline:
      * K of the first matmul is sublane-aligned (multiple of 8).
      * num_classes is lane-padded to a multiple of 128 with zero columns so
        the logits store is lane-dense; the wrapper slices back.
    Weights can optionally be stored bf16 (v6e/v7x MXU win); biases stay f32.
    """
    k1, k2, k3, k4, k5, k6 = jax.random.split(key, 6)
    k_pad = _round_up(in_features, _SUBLANE)
    c_pad = _round_up(num_classes, _LANE)

    def lin(kw, kb, fan_in, fan_out, pad_in, pad_out):
        bound = 1.0 / jnp.sqrt(fan_in)
        w = jax.random.uniform(kw, (fan_in, fan_out), jnp.float32, -bound, bound)
        b = jax.random.uniform(kb, (1, fan_out), jnp.float32, -bound, bound)
        w = jnp.pad(w, ((0, pad_in - fan_in), (0, pad_out - fan_out)))
        b = jnp.pad(b, ((0, 0), (0, pad_out - fan_out)))
        return w.astype(weight_dtype), b

    w1, b1 = lin(k1, k2, in_features, feature_dim, k_pad, feature_dim)
    wr, br = lin(k3, k4, feature_dim, feature_dim, feature_dim, feature_dim)
    wl, bl = lin(k5, k6, feature_dim, num_classes, feature_dim, c_pad)
    return {"w1": w1, "b1": b1, "wr": wr, "br": br, "wl": wl, "bl": bl}


def reference_forward(x, params, num_classes):
    """Pure-JAX reference (uses the same padded params; slices real classes)."""
    k_pad = params["w1"].shape[0]
    if x.shape[1] != k_pad:
        x = jnp.pad(x, ((0, 0), (0, k_pad - x.shape[1])))
    w1 = params["w1"].astype(jnp.float32)
    wr = params["wr"].astype(jnp.float32)
    wl = params["wl"].astype(jnp.float32)
    h = jnp.maximum(x @ w1 + params["b1"], 0.0)
    h = jnp.maximum(h @ wr + params["br"], 0.0) + h
    logits = h @ wl + params["bl"]
    return logits[:, :num_classes], h


if __name__ == "__main__":
    key = jax.random.PRNGKey(0)
    kx, kp = jax.random.split(key)

    batch = 8
    in_features = 16
    feature_dim = 128
    num_classes = 10

    x = jax.random.normal(kx, (batch, in_features), jnp.float32)
    params = init_params(kp, in_features, feature_dim, num_classes)

    # Path with features.
    logits, feats = tabular_resnet_forward(
        x, params, num_classes, return_features=True)
    logits = jax.block_until_ready(logits)
    feats = jax.block_until_ready(feats)

    # Common inference path (no features writeback).
    logits_only = jax.block_until_ready(
        tabular_resnet_forward(x, params, num_classes, return_features=False))

    ref_logits, ref_feats = reference_forward(x, params, num_classes)
    assert logits.shape == (batch, num_classes)
    assert feats.shape == (batch, feature_dim)
    assert jnp.allclose(logits, ref_logits, atol=1e-4, rtol=1e-4)
    assert jnp.allclose(feats, ref_feats, atol=1e-4, rtol=1e-4)
    assert jnp.allclose(logits_only, ref_logits, atol=1e-4, rtol=1e-4)

    print("KERNEL_OK")
</pallas_src>

<mosaic_0001>
module attributes {stable_mosaic.version = 11 : i64} {
  func.func @_kernel_logits_feats(%arg0: i32, %arg1: memref<8x16xf32, #tpu.memory_space<vmem>>, %arg2: memref<16x128xf32, #tpu.memory_space<vmem>>, %arg3: memref<1x128xf32, #tpu.memory_space<vmem>>, %arg4: memref<128x128xf32, #tpu.memory_space<vmem>>, %arg5: memref<1x128xf32, #tpu.memory_space<vmem>>, %arg6: memref<128x128xf32, #tpu.memory_space<vmem>>, %arg7: memref<1x128xf32, #tpu.memory_space<vmem>>, %arg8: memref<8x128xf32, #tpu.memory_space<vmem>>, %arg9: memref<8x128xf32, #tpu.memory_space<vmem>>) attributes {dimension_semantics = [#tpu.dimension_semantics<parallel>], iteration_bounds = array<i64: 1>, scalar_prefetch = 0 : i64, scratch_operands = 0 : i64, tpu.core_type = #tpu.core_type<tc>, window_params = [{transform_indices = @transform_0, window_bounds = array<i64: 8, 16>}, {pipeline_mode = #tpu.pipeline_mode<synchronous>, transform_indices = @transform_1, window_bounds = array<i64: 16, 128>}, {pipeline_mode = #tpu.pipeline_mode<synchronous>, transform_indices = @transform_2, window_bounds = array<i64: 1, 128>}, {pipeline_mode = #tpu.pipeline_mode<synchronous>, transform_indices = @transform_3, window_bounds = array<i64: 128, 128>}, {pipeline_mode = #tpu.pipeline_mode<synchronous>, transform_indices = @transform_4, window_bounds = array<i64: 1, 128>}, {pipeline_mode = #tpu.pipeline_mode<synchronous>, transform_indices = @transform_5, window_bounds = array<i64: 128, 128>}, {pipeline_mode = #tpu.pipeline_mode<synchronous>, transform_indices = @transform_6, window_bounds = array<i64: 1, 128>}, {transform_indices = @transform_7, window_bounds = array<i64: 8, 128>}, {transform_indices = @transform_8, window_bounds = array<i64: 8, 128>}]} {
    %c0 = arith.constant 0 : index
    %c0_0 = arith.constant 0 : index
    %0 = vector.load %arg1[%c0, %c0_0] : memref<8x16xf32, #tpu.memory_space<vmem>>, vector<8x16xf32>
    %c0_1 = arith.constant 0 : index
    %c0_2 = arith.constant 0 : index
    %1 = vector.load %arg2[%c0_1, %c0_2] : memref<16x128xf32, #tpu.memory_space<vmem>>, vector<16x128xf32>
    %cst = arith.constant dense<0.000000e+00> : vector<8x128xf32>
    %2 = tpu.matmul %0, %1, %cst {dimension_numbers = #tpu.dot_dimension_numbers<[1], [0], [0], [1], [0, 0, 1, 1], [], []>} : vector<8x16xf32>, vector<16x128xf32>, vector<8x128xf32> -> vector<8x128xf32>
    %c0_3 = arith.constant 0 : index
    %c0_4 = arith.constant 0 : index
    %3 = vector.load %arg3[%c0_3, %c0_4] : memref<1x128xf32, #tpu.memory_space<vmem>>, vector<1x128xf32>
    %4 = vector.broadcast %3 : vector<1x128xf32> to vector<8x128xf32>
    %5 = arith.addf %2, %4 : vector<8x128xf32>
    %cst_5 = arith.constant 0.000000e+00 : f32
    %6 = vector.broadcast %cst_5 : f32 to vector<8x128xf32>
    %7 = arith.maximumf %5, %6 : vector<8x128xf32>
    %c0_6 = arith.constant 0 : index
    %c0_7 = arith.constant 0 : index
    %8 = vector.load %arg4[%c0_6, %c0_7] : memref<128x128xf32, #tpu.memory_space<vmem>>, vector<128x128xf32>
    %cst_8 = arith.constant dense<0.000000e+00> : vector<8x128xf32>
    %9 = tpu.matmul %7, %8, %cst_8 {dimension_numbers = #tpu.dot_dimension_numbers<[1], [0], [0], [1], [0, 0, 1, 1], [], []>} : vector<8x128xf32>, vector<128x128xf32>, vector<8x128xf32> -> vector<8x128xf32>
    %c0_9 = arith.constant 0 : index
    %c0_10 = arith.constant 0 : index
    %10 = vector.load %arg5[%c0_9, %c0_10] : memref<1x128xf32, #tpu.memory_space<vmem>>, vector<1x128xf32>
    %11 = vector.broadcast %10 : vector<1x128xf32> to vector<8x128xf32>
    %12 = arith.addf %9, %11 : vector<8x128xf32>
    %cst_11 = arith.constant 0.000000e+00 : f32
    %13 = vector.broadcast %cst_11 : f32 to vector<8x128xf32>
    %14 = arith.maximumf %12, %13 : vector<8x128xf32>
    %15 = arith.addf %14, %7 : vector<8x128xf32>
    %c0_12 = arith.constant 0 : index
    %c0_13 = arith.constant 0 : index
    %16 = vector.load %arg6[%c0_12, %c0_13] : memref<128x128xf32, #tpu.memory_space<vmem>>, vector<128x128xf32>
    %cst_14 = arith.constant dense<0.000000e+00> : vector<8x128xf32>
    %17 = tpu.matmul %15, %16, %cst_14 {dimension_numbers = #tpu.dot_dimension_numbers<[1], [0], [0], [1], [0, 0, 1, 1], [], []>} : vector<8x128xf32>, vector<128x128xf32>, vector<8x128xf32> -> vector<8x128xf32>
    %c0_15 = arith.constant 0 : index
    %c0_16 = arith.constant 0 : index
    %18 = vector.load %arg7[%c0_15, %c0_16] : memref<1x128xf32, #tpu.memory_space<vmem>>, vector<1x128xf32>
    %19 = vector.broadcast %18 : vector<1x128xf32> to vector<8x128xf32>
    %20 = arith.addf %17, %19 : vector<8x128xf32>
    %c0_17 = arith.constant 0 : index
    %c0_18 = arith.constant 0 : index
    %21 = vector.load %arg9[%c0_17, %c0_18] : memref<8x128xf32, #tpu.memory_space<vmem>>, vector<8x128xf32>
    tpu.vector_store %arg9[%c0_17, %c0_18], %15 {strides = array<i32>} : memref<8x128xf32, #tpu.memory_space<vmem>>, vector<8x128xf32>,
    %c0_19 = arith.constant 0 : index
    %c0_20 = arith.constant 0 : index
    %22 = vector.load %arg8[%c0_19, %c0_20] : memref<8x128xf32, #tpu.memory_space<vmem>>, vector<8x128xf32>
    tpu.vector_store %arg8[%c0_19, %c0_20], %20 {strides = array<i32>} : memref<8x128xf32, #tpu.memory_space<vmem>>, vector<8x128xf32>,
    return
  }
  func.func @transform_0(%arg0: i32) -> (i32, i32) {
    %c0_i32 = arith.constant 0 : i32
    %c0_i32_0 = arith.constant 0 : i32
    return %arg0, %c0_i32 : i32, i32
  }
  func.func @transform_1(%arg0: i32) -> (i32, i32) {
    %c0_i32 = arith.constant 0 : i32
    %c0_i32_0 = arith.constant 0 : i32
    %c0_i32_1 = arith.constant 0 : i32
    return %c0_i32, %c0_i32_0 : i32, i32
  }
  func.func @transform_2(%arg0: i32) -> (i32, i32) {
    %c0_i32 = arith.constant 0 : i32
    %c0_i32_0 = arith.constant 0 : i32
    %c0_i32_1 = arith.constant 0 : i32
    return %c0_i32, %c0_i32_0 : i32, i32
  }
  func.func @transform_3(%arg0: i32) -> (i32, i32) {
    %c0_i32 = arith.constant 0 : i32
    %c0_i32_0 = arith.constant 0 : i32
    %c0_i32_1 = arith.constant 0 : i32
    return %c0_i32, %c0_i32_0 : i32, i32
  }
  func.func @transform_4(%arg0: i32) -> (i32, i32) {
    %c0_i32 = arith.constant 0 : i32
    %c0_i32_0 = arith.constant 0 : i32
    %c0_i32_1 = arith.constant 0 : i32
    return %c0_i32, %c0_i32_0 : i32, i32
  }
  func.func @transform_5(%arg0: i32) -> (i32, i32) {
    %c0_i32 = arith.constant 0 : i32
    %c0_i32_0 = arith.constant 0 : i32
    %c0_i32_1 = arith.constant 0 : i32
    return %c0_i32, %c0_i32_0 : i32, i32
  }
  func.func @transform_6(%arg0: i32) -> (i32, i32) {
    %c0_i32 = arith.constant 0 : i32
    %c0_i32_0 = arith.constant 0 : i32
    %c0_i32_1 = arith.constant 0 : i32
    return %c0_i32, %c0_i32_0 : i32, i32
  }
  func.func @transform_7(%arg0: i32) -> (i32, i32) {
    %c0_i32 = arith.constant 0 : i32
    %c0_i32_0 = arith.constant 0 : i32
    return %arg0, %c0_i32 : i32, i32
  }
  func.func @transform_8(%arg0: i32) -> (i32, i32) {
    %c0_i32 = arith.constant 0 : i32
    %c0_i32_0 = arith.constant 0 : i32
    return %arg0, %c0_i32 : i32, i32
  }
}

</mosaic_0001>

<bundles_post_ra>
// kernel: tabular_resnet_forward.1
= control target key start
LH: loop header
LB: loop body
LE: loop exit
PB: predicated region body
PF: predicated region fallthrough
CT: control target
= control target key end

     0   :  { %14 = vsyncpa [#allocation3], 0  ;;  %s778_s0 = inlined_call_operand.hbm [shape: f32[8,16], index: 0, kind: input, shape index: {}]   ;;  %s779_s1 = inlined_call_operand.hbm [shape: f32[16,128], index: 1, kind: input, shape index: {}]   ;;  %s780_s2 = inlined_call_operand.vmem [shape: f32[1,128], index: 2, kind: input, shape index: {}]   ;;  %s781_s3 = inlined_call_operand.hbm [shape: f32[128,128], index: 3, kind: input, shape index: {}]   ;;  %s782_s4 = inlined_call_operand.vmem [shape: f32[1,128], index: 4, kind: input, shape index: {}]   ;;  %s783_s5 = inlined_call_operand.hbm [shape: f32[128,128], index: 5, kind: input, shape index: {}]   ;;  %s784_s6 = inlined_call_operand.vmem [shape: f32[1,128], index: 6, kind: input, shape index: {}]   ;;  %s785_s7 = inlined_call_operand.hbm [shape: f32[8,128], index: 7, kind: output, shape index: {0}]   ;;  %s786_s8 = inlined_call_operand.hbm [shape: f32[8,128], index: 8, kind: output, shape index: {1}]  }
   0x1   :  { %15 = vsyncpa [#allocation6], 0 }
   0x2   :  { %16 = vsyncpa [#allocation9], 0 }
   0x3   :  { %17 = vsyncpa [#allocation4], 0 }
   0x4   :  { %18 = vsyncpa [#allocation12], 0  ;;  %s647_s27 = smov [#allocation5]  }
   0x5   :  { %s34_s28 = sshll.u32 %s647_s27, 4  ;;  %s35_s28 = int_to_ptr.vmem [resolvable:$true] %s34_s28 }
   0x6   :  { %s525_s29 = scalar_lea.vmem %s35_s28, 256  ;;  %p530_p1 = scmp.lt.s32.totalorder %s35_s28, %s35_s28 }
   0x7   :  { %p526_p0 = scmp.ne.s32.totalorder %s35_s28, %s525_s29  ;;  %p531_p2 = scmp.lt.s32.totalorder %s525_s29, %s525_s29 }
   0x9   :  { %p532_p3 = por %p531_p2, %p530_p1 }
   0xb   :  { %p533_p4 = pnand %p532_p3, %p526_p0 }
   0xd   :  { %536 = shalt.err (!%p533_p4)
}
   0xe   :  { %s648_s30 = smov 128   ;;  %s649_s9 = smov 8  }
   0xf   :  { %40 = dma.hbm_to_vmem [thread:$0]  %s779_s1, 256, %s35_s28, [#allocation6], %s648_s30, %s648_s30, %s649_s9  }
  0x10   :  { %s650_s12 = smov [#allocation2]   ;;  %s651_s14 = smov [#allocation7]  }
  0x11   :  { %s25_s13 = sshll.u32 %s650_s12, 4  ;;  %s48_s15 = sshll.u32 %s651_s14, 4  ;;  %s26_s13 = int_to_ptr.vmem [resolvable:$true] %s25_s13  ;;  %s49_s15 = int_to_ptr.vmem [resolvable:$true] %s48_s15 }
  0x12   :  { %s545_s16 = scalar_lea.vmem %s26_s13, 128  ;;  %p550_p6 = scmp.lt.s32.totalorder %s26_s13, %s26_s13 }
  0x13   :  { %p546_p5 = scmp.ne.s32.totalorder %s26_s13, %s545_s16  ;;  %p551_p7 = scmp.lt.s32.totalorder %s545_s16, %s545_s16 }
  0x15   :  { %p552_p8 = por %p551_p7, %p550_p6 }
  0x17   :  { %p553_p9 = pnand %p552_p8, %p546_p5 }
  0x19   :  { %556 = shalt.err (!%p553_p9)
}
  0x1a   :  { %28 = dma.hbm_to_vmem [thread:$0]  %s778_s0, 128, %s26_s13, [#allocation3]  }
  0x1b   :  { %s565_s19 = scalar_lea.vmem %s49_s15, 2048  ;;  %p570_p11 = scmp.lt.s32.totalorder %s49_s15, %s49_s15 }
  0x1c   :  { %p566_p10 = scmp.ne.s32.totalorder %s49_s15, %s565_s19  ;;  %p571_p12 = scmp.lt.s32.totalorder %s565_s19, %s565_s19 }
  0x1e   :  { %p572_p13 = por %p571_p12, %p570_p11 }
  0x20   :  { %p573_p0 = pnand %p572_p13, %p566_p10 }
  0x22   :  { %576 = shalt.err (!%p573_p0)
}
  0x23   :  { %54 = dma.hbm_to_vmem [thread:$0]  %s781_s3, 2048, %s49_s15, [#allocation6], %s648_s30, %s648_s30, %s649_s9  }
  0x24   :  { %s652_s21 = smov [#allocation8]  }
  0x25   :  { %s62_s22 = sshll.u32 %s652_s21, 4  ;;  %s63_s22 = int_to_ptr.vmem [resolvable:$true] %s62_s22 }
  0x26   :  { %s585_s23 = scalar_lea.vmem %s63_s22, 2048  ;;  %p590_p2 = scmp.lt.s32.totalorder %s63_s22, %s63_s22 }
  0x27   :  { %p586_p1 = scmp.ne.s32.totalorder %s63_s22, %s585_s23  ;;  %p591_p3 = scmp.lt.s32.totalorder %s585_s23, %s585_s23 }
  0x29   :  { %p592_p4 = por %p591_p3, %p590_p2 }
  0x2b   :  { %p593_p5 = pnand %p592_p4, %p586_p1 }
  0x2d   :  { %596 = shalt.err (!%p593_p5)
}
  0x2e   :  { %68 = dma.hbm_to_vmem [thread:$0]  %s783_s5, 2048, %s63_s22, [#allocation9], %s648_s30, %s648_s30, %s649_s9  }
  0x2f   :  { %637 = dma.done.wait [#allocation3], 128  }
  0x30   :  { %638 = vsyncadd [#allocation3], 4294967168 }
  0x31   :  { %639 = dma.done.wait [#allocation6], 2304  }
  0x32   :  { %640 = vsyncadd [#allocation6], 4294964992 }
  0x33   :  { %641 = dma.done.wait [#allocation9], 2048  }
  0x34   :  { %642 = vsyncadd [#allocation9], 4294965248  ;;  %v653_v0 = vmov 0.0   ;;  %vm654_vm0 = vmmov 0   ;;  %v85_v1 = vld [vmem:[#allocation5 + $0x8] sm:$0xff]  ;;  %v84_v2 = vld [vmem:[#allocation5] sm:$0xff] }
  0x35   :  { %430 = vmatprep.subr.mxu0 %v653_v0  ;;  %434 = vmatprep.mubr.msk.f32.mxu0 %vm654_vm0, %v653_v0  ;;  %v83_v3 = vld [vmem:[#allocation2] sm:$0xff]  ;;  %vm93_vm1 = vcmask 130048   ;;  %v183_v4 = vld [vmem:[#allocation7 + $0x78] sm:$0xff]  ;;  %v182_v5 = vld [vmem:[#allocation7 + $0x70] sm:$0xff]  ;;  %s655_s26 = smov [#allocation11]  }
  0x36   :  { %437 = vmatprep.subr.mxu1 %v653_v0  ;;  %469 = vmatprep.mubr.msk.f32.mxu1 %vm654_vm0, %v653_v0  ;;  %v181_v6 = vld [vmem:[#allocation7 + $0x68] sm:$0xff]  ;;  %v180_v7 = vld [vmem:[#allocation7 + $0x60] sm:$0xff]  ;;  %v179_v8 = vld [vmem:[#allocation7 + $0x58] sm:$0xff]  ;;  %s374_s27 = sshll.u32 %s655_s26, 4  ;;  %s375_s27 = int_to_ptr.vmem [resolvable:$true] %s374_s27 }
  0x37   :  { %431 = vmatpush3.msra.mxu0 %v85_v1  ;;  %438 = vmatpush3.msra.mxu1 %v183_v4  ;;  %v178_v9 = vld [vmem:[#allocation7 + $0x50] sm:$0xff]  ;;  %v177_v10 = vld [vmem:[#allocation7 + $0x48] sm:$0xff]  ;;  %v176_v11 = vld [vmem:[#allocation7 + $0x40] sm:$0xff]  ;;  %s597_s28 = scalar_lea.vmem %s375_s27, 128  ;;  %p602_p7 = scmp.lt.s32.totalorder %s375_s27, %s375_s27 }
  0x38   :  { %432 = vmatprep.subr.mxu0 %v653_v0  ;;  %439 = vmatprep.subr.mxu1 %v653_v0  ;;  %v175_v12 = vld [vmem:[#allocation7 + $0x38] sm:$0xff]  ;;  %v174_v13 = vld [vmem:[#allocation7 + $0x30] sm:$0xff]  ;;  %v173_v14 = vld [vmem:[#allocation7 + $0x28] sm:$0xff]  ;;  %p598_p6 = scmp.ne.s32.totalorder %s375_s27, %s597_s28  ;;  %p603_p8 = scmp.lt.s32.totalorder %s597_s28, %s597_s28 }
  0x39   :  { %433 = vmatpush3.msra.mxu0 %v84_v2  ;;  %440 = vmatpush3.msra.mxu1 %v182_v5  ;;  %v172_v15 = vld [vmem:[#allocation7 + $0x20] sm:$0xff]  ;;  %v171_v16 = vld [vmem:[#allocation7 + $0x18] sm:$0xff]  ;;  %v170_v17 = vld [vmem:[#allocation7 + $0x10] sm:$0xff] }
  0x3a   :  { %435 = vmatmul.mubr.msk.f32.vlgmr.msra.gmra.mxu0 %vm93_vm1, %v83_v3  ;;  %441 = vmatprep.subr.mxu1 %v653_v0  ;;  %v169_v18 = vld [vmem:[#allocation7 + $0x8] sm:$0xff]  ;;  %v168_v19 = vld [vmem:[#allocation7] sm:$0xff]  ;;  %v278_v20 = vld [vmem:[#allocation8 + $0x78] sm:$0xff]  ;;  %p604_p9 = por %p603_p8, %p602_p7 }
  0x3b   :  { %472 = vmatprep.subr.mxu0 %v653_v0  ;;  %442 = vmatpush3.msra.mxu1 %v181_v6  ;;  %v277_v21 = vld [vmem:[#allocation8 + $0x70] sm:$0xff]  ;;  %v276_v22 = vld [vmem:[#allocation8 + $0x68] sm:$0xff]  ;;  %v275_v23 = vld [vmem:[#allocation8 + $0x60] sm:$0xff] }
  0x3c   :  { %504 = vmatprep.mubr.msk.f32.mxu0 %vm654_vm0, %v653_v0  ;;  %443 = vmatprep.subr.mxu1 %v653_v0  ;;  %v274_v24 = vld [vmem:[#allocation8 + $0x58] sm:$0xff]  ;;  %v273_v25 = vld [vmem:[#allocation8 + $0x50] sm:$0xff]  ;;  %v272_v26 = vld [vmem:[#allocation8 + $0x48] sm:$0xff]  ;;  %p605_p10 = pnand %p604_p9, %p598_p6 }
  0x3d   :  { %444 = vmatpush3.msra.mxu1 %v180_v7  ;;  %473 = vmatpush3.msra.mxu0 %v278_v20  ;;  %v271_v27 = vld [vmem:[#allocation8 + $0x40] sm:$0xff]  ;;  %v270_v28 = vld [vmem:[#allocation8 + $0x38] sm:$0xff]  ;;  %v269_v29 = vld [vmem:[#allocation8 + $0x30] sm:$0xff] }
  0x3e   :  { %445 = vmatprep.subr.mxu1 %v653_v0  ;;  %474 = vmatprep.subr.mxu0 %v653_v0  ;;  %v268_v30 = vld [vmem:[#allocation8 + $0x28] sm:$0xff]  ;;  %v267_v31 = vld [vmem:[#allocation8 + $0x20] sm:$0xff]  ;;  %v266_v37 = vld [vmem:[#allocation8 + $0x18] sm:$0xff] }
  0x3f   :  { %446 = vmatpush3.msra.mxu1 %v179_v8  ;;  %475 = vmatpush3.msra.mxu0 %v277_v21  ;;  %v389_v32 = vld [vmem:[%s780_s2] ss:$0 sm:$0xff]  ;;  %v265_v38 = vld [vmem:[#allocation8 + $0x10] sm:$0xff]  ;;  %v263_v40 = vld [vmem:[#allocation8] sm:$0xff] }
  0x40   :  { %447 = vmatprep.subr.mxu1 %v653_v0  ;;  %476 = vmatprep.subr.mxu0 %v653_v0  ;;  %v264_v39 = vld [vmem:[#allocation8 + $0x8] sm:$0xff] }
  0x41   :  { %448 = vmatpush3.msra.mxu1 %v178_v9  ;;  %477 = vmatpush3.msra.mxu0 %v276_v22  ;;  %v391_v41 = vld [vmem:[%s782_s4] ss:$0 sm:$0xff] }
  0x42   :  { %449 = vmatprep.subr.mxu1 %v653_v0  ;;  %478 = vmatprep.subr.mxu0 %v653_v0 }
  0x43   :  { %450 = vmatpush3.msra.mxu1 %v177_v10  ;;  %479 = vmatpush3.msra.mxu0 %v275_v23 }
  0x44   :  { %451 = vmatprep.subr.mxu1 %v653_v0  ;;  %480 = vmatprep.subr.mxu0 %v653_v0 }
  0x45   :  { %452 = vmatpush3.msra.mxu1 %v176_v11  ;;  %481 = vmatpush3.msra.mxu0 %v274_v24 }
  0x46   :  { %453 = vmatprep.subr.mxu1 %v653_v0  ;;  %482 = vmatprep.subr.mxu0 %v653_v0 }
  0x47   :  { %454 = vmatpush3.msra.mxu1 %v175_v12  ;;  %483 = vmatpush3.msra.mxu0 %v273_v25 }
  0x48   :  { %455 = vmatprep.subr.mxu1 %v653_v0  ;;  %484 = vmatprep.subr.mxu0 %v653_v0 }
  0x49   :  { %456 = vmatpush3.msra.mxu1 %v174_v13  ;;  %485 = vmatpush3.msra.mxu0 %v272_v26 }
  0x4a   :  { %457 = vmatprep.subr.mxu1 %v653_v0  ;;  %486 = vmatprep.subr.mxu0 %v653_v0 }
  0x4b   :  { %458 = vmatpush3.msra.mxu1 %v173_v14  ;;  %487 = vmatpush3.msra.mxu0 %v271_v27 }
  0x4c   :  { %459 = vmatprep.subr.mxu1 %v653_v0  ;;  %488 = vmatprep.subr.mxu0 %v653_v0 }
  0x4d   :  { %460 = vmatpush3.msra.mxu1 %v172_v15  ;;  %489 = vmatpush3.msra.mxu0 %v270_v28 }
  0x4e   :  { %461 = vmatprep.subr.mxu1 %v653_v0  ;;  %490 = vmatprep.subr.mxu0 %v653_v0 }
  0x4f   :  { %462 = vmatpush3.msra.mxu1 %v171_v16  ;;  %491 = vmatpush3.msra.mxu0 %v269_v29 }
  0x50   :  { %463 = vmatprep.subr.mxu1 %v653_v0  ;;  %492 = vmatprep.subr.mxu0 %v653_v0 }
  0x51   :  { %464 = vmatpush3.msra.mxu1 %v170_v17  ;;  %493 = vmatpush3.msra.mxu0 %v268_v30 }
  0x52   :  { %465 = vmatprep.subr.mxu1 %v653_v0  ;;  %494 = vmatprep.subr.mxu0 %v653_v0 }
  0x53   :  { %466 = vmatpush3.msra.mxu1 %v169_v18  ;;  %495 = vmatpush3.msra.mxu0 %v267_v31 }
  0x54   :  { %467 = vmatprep.subr.mxu1 %v653_v0  ;;  %496 = vmatprep.subr.mxu0 %v653_v0 }
  0x55   :  { %468 = vmatpush3.msra.mxu1 %v168_v19  ;;  %497 = vmatpush3.msra.mxu0 %v266_v37 }
  0x56   :  { %498 = vmatprep.subr.mxu0 %v653_v0 }
  0x57   :  { %499 = vmatpush3.msra.mxu0 %v265_v38 }
  0x58   :  { %500 = vmatprep.subr.mxu0 %v653_v0 }
  0x59   :  { %501 = vmatpush3.msra.mxu0 %v264_v39 }
  0x5a   :  { %502 = vmatprep.subr.mxu0 %v653_v0 }
  0x5b   :  { %503 = vmatpush3.msra.mxu0 %v263_v40 }
  0xfa   :  { %v163_v33 = vpop.f32.mrf.mxu0 }
  0xfb   :  { %v164_v34 = vadd.f32 %v389_v32, %v163_v33 }
  0xfc   :  { %v436_v35 = vpop.f32.mrf.mxu0 }
  0xfd   :  { %v167_v36 = vmax.f32 %v164_v34, 0.0 }
  0xff   :  { %470 = vmatmul.mubr.f32.vlgmr.msra.gmra.mxu1 %v167_v36 }
 0x1bf   :  { %v257_v42 = vpop.f32.mrf.mxu1 }
 0x1c0   :  { %v258_v43 = vadd.f32 %v391_v41, %v257_v42 }
 0x1c1   :  { %v471_v44 = vpop.f32.mrf.mxu1 }
 0x1c2   :  { %v261_v45 = vmax.f32 %v258_v43, 0.0 }
 0x1c4   :  { %v262_v46 = vadd.f32 %v261_v45, %v167_v36 }
 0x1c6   :  { %356 = vst [vmem:[#allocation11] sm:$0xff] %v262_v46  ;;  %505 = vmatmul.mubr.f32.vlgmr.msra.gmra.mxu0 %v262_v46 }
 0x1c7   :  { %608 = shalt.err (!%p605_p10)
}
 0x1c8   :  { %377 = dma.vmem_to_hbm [thread:$0]  %s375_s27, 128, %s786_s8, [#allocation12]   ;;  %v392_v47 = vld [vmem:[%s784_s6] ss:$0 sm:$0xff] }
 0x1c9   :  { %s656_s10 = smov [#allocation10]  }
 0x1ca   :  { %s364_s11 = sshll.u32 %s656_s10, 4  ;;  %s365_s11 = int_to_ptr.vmem [resolvable:$true] %s364_s11 }
 0x1cb   :  { %s617_s12 = scalar_lea.vmem %s365_s11, 128  ;;  %p622_p12 = scmp.lt.s32.totalorder %s365_s11, %s365_s11 }
 0x1cc   :  { %p618_p11 = scmp.ne.s32.totalorder %s365_s11, %s617_s12  ;;  %p623_p13 = scmp.lt.s32.totalorder %s617_s12, %s617_s12 }
 0x1ce   :  { %p624_p0 = por %p623_p13, %p622_p12 }
 0x1d0   :  { %p625_p1 = pnand %p624_p0, %p618_p11 }
 0x286   :  { %v352_v48 = vpop.f32.mrf.mxu0 }
 0x287   :  { %v353_v49 = vadd.f32 %v392_v47, %v352_v48 }
 0x288   :  { %v506_v50 = vpop.f32.mrf.mxu0 }
 0x289   :  { %357 = vst [vmem:[#allocation10] sm:$0xff] %v353_v49 }
 0x28a   :  { %628 = shalt.err (!%p625_p1)
}
 0x28b   :  { %367 = dma.vmem_to_hbm [thread:$0]  %s365_s11, 128, %s785_s7, [#allocation4]  }
 0x28c   :  { %643 = dma.done.wait [#allocation4], 128  }
 0x28d   :  { %644 = vsyncadd [#allocation4], 4294967168 }
 0x28e   :  { %645 = dma.done.wait [#allocation12], 128  }
 0x28f   :  { %646 = vsyncadd [#allocation12], 4294967168 }
 0x290   :  { %384 = vsyncpa [#allocation3], 1 }
 0x291   :  { %385 = vsyncpa [#allocation6], 1 }
 0x292   :  { %386 = vsyncpa [#allocation9], 1 }
 0x293   :  { %387 = vsyncpa [#allocation4], 1 }
 0x294   :  { %388 = vsyncpa [#allocation12], 1 }

</bundles_post_ra>
